<compile_context>
chip_gen: v5e
topology: v5e:2x2
jax: 0.10.0
libtpu: 0.0.40
codegen_flags: <defaults>
</compile_context>

<pallas_src>
from functools import partial

import jax
import jax.numpy as jnp
from jax.experimental import pallas as pl
from jax.experimental.pallas import tpu as pltpu


def _encoder_layer_kernel(
    seq_ref,                  # (1, S, E)  f32
    ln1_g_ref, ln1_b_ref,     # (1, E)     f32
    wqkv_ref, bqkv_ref,       # (E, 3E) matmul_dtype, (1, 3E) f32
    wo_ref, bo_ref,           # (E, E)  matmul_dtype, (1, E)  f32
    ln2_g_ref, ln2_b_ref,     # (1, E)     f32
    w1_ref, b1_ref,           # (E, F)  matmul_dtype, (1, F)  f32
    w2_ref, b2_ref,           # (F, E)  matmul_dtype, (1, E)  f32
    out_ref,                  # (1, S, E)  f32
    *, num_heads: int, embed_dim: int, norm_eps: float, matmul_dtype,
):
    E = embed_dim
    H = num_heads
    Dh = E // H
    scale = 1.0 / (Dh ** 0.5)

    seq = seq_ref[0]                                        # (S, E) f32

    def layernorm(x, g, b):
        mu = jnp.mean(x, axis=-1, keepdims=True)
        var = jnp.mean((x - mu) ** 2, axis=-1, keepdims=True)
        return (x - mu) * jax.lax.rsqrt(var + norm_eps) * g + b

    def mm(a, w_ref, b_ref):
        # bf16 (or f32) operands on the MXU, f32 accumulation, bias in f32.
        return (jnp.dot(a.astype(matmul_dtype), w_ref[...],
                        preferred_element_type=jnp.float32) + b_ref[0])

    # ---------------- norm1 + multi-head self-attention ----------------
    x = layernorm(seq, ln1_g_ref[0], ln1_b_ref[0])
    qkv = mm(x, wqkv_ref, bqkv_ref)                         # (S, 3E) f32

    def split_heads(base):
        # (S, E)-feature slab -> (H, S, Dh), heads on the leading (batch) dim.
        return jnp.stack(
            [qkv[:, base + h * Dh: base + (h + 1) * Dh] for h in range(H)],
            axis=0)

    q = split_heads(0)                                      # (H, S, Dh) f32
    k = split_heads(E)
    v = split_heads(2 * E)

    # Batched-head attention: leading batch dim, minor-dim contractions.
    s = jnp.einsum("hqd,hkd->hqk",
                   q.astype(matmul_dtype), k.astype(matmul_dtype),
                   preferred_element_type=jnp.float32) * scale   # (H, S, S)
    s = s - jnp.max(s, axis=-1, keepdims=True)
    p = jnp.exp(s)
    p = p * pl.reciprocal(jnp.sum(p, axis=-1, keepdims=True), approx=True)
    ctx = jnp.einsum("hqk,hkd->hqd",
                     p.astype(matmul_dtype), v.astype(matmul_dtype),
                     preferred_element_type=jnp.float32)         # (H, S, Dh)

    # Merge heads back to (S, E) (matches the reference's per-head concat).
    ctx = jnp.concatenate([ctx[h] for h in range(H)], axis=-1)
    attn = mm(ctx, wo_ref, bo_ref)                          # (S, E) f32

    seq = seq + attn                                        # residual 1 (dropout1 = identity)

    # ---------------- norm2 + MLP (relu) ----------------
    x = layernorm(seq, ln2_g_ref[0], ln2_b_ref[0])
    hdn = jnp.maximum(mm(x, w1_ref, b1_ref), 0.0)           # (S, F)
    y = mm(hdn, w2_ref, b2_ref)                             # (S, E)

    out_ref[0] = seq + y                                    # residual 2 (dropout2 = identity)


def encoder_layer(seq, params, *, num_heads: int, norm_eps: float = 1e-5,
                  matmul_dtype=jnp.float32):
    """seq: (B, S, E) float32.  params: dict of weights (see __main__)."""
    B, S, E = seq.shape
    F = params["w1"].shape[1]

    def wcast(w):
        return w.astype(matmul_dtype)

    args = (
        seq,
        params["ln1_g"], params["ln1_b"],
        wcast(params["wqkv"]), params["bqkv"],
        wcast(params["wo"]), params["bo"],
        params["ln2_g"], params["ln2_b"],
        wcast(params["w1"]), params["b1"],
        wcast(params["w2"]), params["b2"],
    )

    def resident(shape):
        # Constant index_map + single buffer: loaded once, stays resident
        # (no pointless double-buffering of revisited weight blocks).
        return pl.BlockSpec(shape, lambda b: (0, 0),
                            pipeline_mode=pl.Buffered(1))

    in_specs = [
        pl.BlockSpec((1, S, E), lambda b: (b, 0, 0)),       # seq (pipelined over B)
        resident((1, E)), resident((1, E)),                 # ln1 gamma / beta
        resident((E, 3 * E)), resident((1, 3 * E)),         # qkv projection
        resident((E, E)), resident((1, E)),                 # out projection
        resident((1, E)), resident((1, E)),                 # ln2 gamma / beta
        resident((E, F)), resident((1, F)),                 # mlp linear1
        resident((F, E)), resident((1, E)),                 # mlp linear2
    ]
    out_spec = pl.BlockSpec((1, S, E), lambda b: (b, 0, 0))

    # VMEM budget: single-buffered weights/biases + double-buffered (1,S,E)
    # in/out blocks + in-kernel activations, with ~50% headroom.
    weight_bytes = sum(int(a.size) * a.dtype.itemsize for a in args[1:])
    io_bytes = 2 * 2 * S * E * 4
    act_bytes = 4 * S * (8 * E + 3 * E + F) + 4 * num_heads * S * S * 3
    vmem_limit = int(1.5 * (weight_bytes + io_bytes + act_bytes))
    vmem_limit = max(vmem_limit, 4 * 1024 * 1024)
    vmem_limit = min(vmem_limit, 100 * 1024 * 1024)

    kernel = partial(
        _encoder_layer_kernel,
        num_heads=num_heads, embed_dim=E, norm_eps=norm_eps,
        matmul_dtype=matmul_dtype,
    )

    return pl.pallas_call(
        kernel,
        out_shape=jax.ShapeDtypeStruct((B, S, E), jnp.float32),
        grid_spec=pltpu.PrefetchScalarGridSpec(
            num_scalar_prefetch=0,
            grid=(B,),
            in_specs=in_specs,
            out_specs=out_spec,
        ),
        compiler_params=pltpu.CompilerParams(
            dimension_semantics=("parallel",),
            vmem_limit_bytes=vmem_limit,
        ),
    )(*args)


def _reference(seq, params, *, num_heads, norm_eps=1e-5):
    """Pure-JAX reference matching the PyTorch forward semantics (f32)."""
    E = seq.shape[-1]
    Dh = E // num_heads

    def ln(x, g, b):
        mu = jnp.mean(x, axis=-1, keepdims=True)
        var = jnp.mean((x - mu) ** 2, axis=-1, keepdims=True)
        return (x - mu) / jnp.sqrt(var + norm_eps) * g[0] + b[0]

    x = ln(seq, params["ln1_g"], params["ln1_b"])
    qkv = x @ params["wqkv"] + params["bqkv"][0]
    q, k, v = jnp.split(qkv, 3, axis=-1)
    B, S, _ = q.shape
    q = q.reshape(B, S, num_heads, Dh).transpose(0, 2, 1, 3)
    k = k.reshape(B, S, num_heads, Dh).transpose(0, 2, 1, 3)
    v = v.reshape(B, S, num_heads, Dh).transpose(0, 2, 1, 3)
    s = jnp.einsum("bhqd,bhkd->bhqk", q, k) / (Dh ** 0.5)
    p = jax.nn.softmax(s, axis=-1)
    o = jnp.einsum("bhqk,bhkd->bhqd", p, v).transpose(0, 2, 1, 3).reshape(B, S, E)
    attn = o @ params["wo"] + params["bo"][0]
    seq = seq + attn
    x = ln(seq, params["ln2_g"], params["ln2_b"])
    y = jax.nn.relu(x @ params["w1"] + params["b1"][0]) @ params["w2"] + params["b2"][0]
    return seq + y


if __name__ == "__main__":
    # Small shapes consistent with the module.
    B, S, E, H, F = 2, 8, 32, 4, 64  # batch, seq, embed_dim, num_heads, dim_feedforward

    key = jax.random.PRNGKey(0)
    ks = jax.random.split(key, 16)

    def xavier(k, shape):
        fan_in, fan_out = shape
        lim = (6.0 / (fan_in + fan_out)) ** 0.5
        return jax.random.uniform(k, shape, jnp.float32, -lim, lim)

    params = {
        "ln1_g": jnp.ones((1, E), jnp.float32),
        "ln1_b": jnp.zeros((1, E), jnp.float32),
        "wqkv":  xavier(ks[0], (E, 3 * E)),
        "bqkv":  1e-6 + 0.02 * jax.random.normal(ks[1], (1, 3 * E), jnp.float32),
        "wo":    xavier(ks[2], (E, E)),
        "bo":    1e-6 + 0.02 * jax.random.normal(ks[3], (1, E), jnp.float32),
        "ln2_g": jnp.ones((1, E), jnp.float32),
        "ln2_b": jnp.zeros((1, E), jnp.float32),
        "w1":    xavier(ks[4], (E, F)),
        "b1":    1e-6 + 0.02 * jax.random.normal(ks[5], (1, F), jnp.float32),
        "w2":    xavier(ks[6], (F, E)),
        "b2":    1e-6 + 0.02 * jax.random.normal(ks[7], (1, E), jnp.float32),
    }

    seq = jax.random.normal(ks[8], (B, S, E), jnp.float32)

    ref = _reference(seq, params, num_heads=H)

    # f32 path: PyTorch-module semantics (only deviation is the approx EUP
    # reciprocal in the softmax, hence the slightly relaxed tolerance).
    out = jax.block_until_ready(encoder_layer(seq, params, num_heads=H))
    assert out.shape == (B, S, E)
    assert jnp.allclose(out, ref, atol=5e-3, rtol=5e-3), "f32 kernel mismatch vs reference"

    # bf16-weight path: halves weight HBM/VMEM traffic, f32 MXU accumulation.
    out_bf16 = jax.block_until_ready(
        encoder_layer(seq, params, num_heads=H, matmul_dtype=jnp.bfloat16))
    assert jnp.allclose(out_bf16, ref, atol=5e-2, rtol=5e-2), "bf16 kernel mismatch vs reference"

    print("KERNEL_OK")
</pallas_src>

<mosaic_0001>
module attributes {stable_mosaic.version = 11 : i64} {
  func.func @_encoder_layer_kernel(%arg0: i32, %arg1: memref<1x8x32xf32, #tpu.memory_space<vmem>>, %arg2: memref<1x32xf32, #tpu.memory_space<vmem>>, %arg3: memref<1x32xf32, #tpu.memory_space<vmem>>, %arg4: memref<32x96xf32, #tpu.memory_space<vmem>>, %arg5: memref<1x96xf32, #tpu.memory_space<vmem>>, %arg6: memref<32x32xf32, #tpu.memory_space<vmem>>, %arg7: memref<1x32xf32, #tpu.memory_space<vmem>>, %arg8: memref<1x32xf32, #tpu.memory_space<vmem>>, %arg9: memref<1x32xf32, #tpu.memory_space<vmem>>, %arg10: memref<32x64xf32, #tpu.memory_space<vmem>>, %arg11: memref<1x64xf32, #tpu.memory_space<vmem>>, %arg12: memref<64x32xf32, #tpu.memory_space<vmem>>, %arg13: memref<1x32xf32, #tpu.memory_space<vmem>>, %arg14: memref<1x8x32xf32, #tpu.memory_space<vmem>>) attributes {dimension_semantics = [#tpu.dimension_semantics<parallel>], iteration_bounds = array<i64: 2>, scalar_prefetch = 0 : i64, scratch_operands = 0 : i64, tpu.core_type = #tpu.core_type<tc>, window_params = [{transform_indices = @transform_0, window_bounds = array<i64: 1, 8, 32>}, {pipeline_mode = #tpu.pipeline_mode<synchronous>, transform_indices = @transform_1, window_bounds = array<i64: 1, 32>}, {pipeline_mode = #tpu.pipeline_mode<synchronous>, transform_indices = @transform_2, window_bounds = array<i64: 1, 32>}, {pipeline_mode = #tpu.pipeline_mode<synchronous>, transform_indices = @transform_3, window_bounds = array<i64: 32, 96>}, {pipeline_mode = #tpu.pipeline_mode<synchronous>, transform_indices = @transform_4, window_bounds = array<i64: 1, 96>}, {pipeline_mode = #tpu.pipeline_mode<synchronous>, transform_indices = @transform_5, window_bounds = array<i64: 32, 32>}, {pipeline_mode = #tpu.pipeline_mode<synchronous>, transform_indices = @transform_6, window_bounds = array<i64: 1, 32>}, {pipeline_mode = #tpu.pipeline_mode<synchronous>, transform_indices = @transform_7, window_bounds = array<i64: 1, 32>}, {pipeline_mode = #tpu.pipeline_mode<synchronous>, transform_indices = @transform_8, window_bounds = array<i64: 1, 32>}, {pipeline_mode = #tpu.pipeline_mode<synchronous>, transform_indices = @transform_9, window_bounds = array<i64: 32, 64>}, {pipeline_mode = #tpu.pipeline_mode<synchronous>, transform_indices = @transform_10, window_bounds = array<i64: 1, 64>}, {pipeline_mode = #tpu.pipeline_mode<synchronous>, transform_indices = @transform_11, window_bounds = array<i64: 64, 32>}, {pipeline_mode = #tpu.pipeline_mode<synchronous>, transform_indices = @transform_12, window_bounds = array<i64: 1, 32>}, {transform_indices = @transform_13, window_bounds = array<i64: 1, 8, 32>}]} {
    %c0 = arith.constant 0 : index
    %c0_0 = arith.constant 0 : index
    %c0_1 = arith.constant 0 : index
    %0 = vector.load %arg1[%c0, %c0_0, %c0_1] : memref<1x8x32xf32, #tpu.memory_space<vmem>>, vector<1x8x32xf32>
    %1 = vector.shape_cast %0 : vector<1x8x32xf32> to vector<8x32xf32>
    %c0_2 = arith.constant 0 : index
    %c0_3 = arith.constant 0 : index
    %2 = vector.load %arg2[%c0_2, %c0_3] : memref<1x32xf32, #tpu.memory_space<vmem>>, vector<1x32xf32>
    %3 = vector.shape_cast %2 : vector<1x32xf32> to vector<32xf32>
    %c0_4 = arith.constant 0 : index
    %c0_5 = arith.constant 0 : index
    %4 = vector.load %arg3[%c0_4, %c0_5] : memref<1x32xf32, #tpu.memory_space<vmem>>, vector<1x32xf32>
    %5 = vector.shape_cast %4 : vector<1x32xf32> to vector<32xf32>
    %cst = arith.constant dense<0.000000e+00> : vector<8xf32>
    %6 = vector.multi_reduction <add>, %1, %cst [1] : vector<8x32xf32> to vector<8xf32>
    %7 = vector.shape_cast %6 : vector<8xf32> to vector<8x1xf32>
    %cst_6 = arith.constant 3.200000e+01 : f32
    %8 = vector.broadcast %cst_6 : f32 to vector<8x1xf32>
    %9 = arith.divf %7, %8 : vector<8x1xf32>
    %10 = vector.broadcast %9 : vector<8x1xf32> to vector<8x32xf32>
    %11 = arith.subf %1, %10 : vector<8x32xf32>
    %12 = arith.mulf %11, %11 : vector<8x32xf32>
    %cst_7 = arith.constant dense<0.000000e+00> : vector<8xf32>
    %13 = vector.multi_reduction <add>, %12, %cst_7 [1] : vector<8x32xf32> to vector<8xf32>
    %14 = vector.shape_cast %13 : vector<8xf32> to vector<8x1xf32>
    %cst_8 = arith.constant 3.200000e+01 : f32
    %15 = vector.broadcast %cst_8 : f32 to vector<8x1xf32>
    %16 = arith.divf %14, %15 : vector<8x1xf32>
    %17 = vector.broadcast %9 : vector<8x1xf32> to vector<8x32xf32>
    %18 = arith.subf %1, %17 : vector<8x32xf32>
    %cst_9 = arith.constant 9.99999974E-6 : f32
    %19 = vector.broadcast %cst_9 : f32 to vector<8x1xf32>
    %20 = arith.addf %16, %19 : vector<8x1xf32>
    %21 = math.rsqrt %20 : vector<8x1xf32>
    %22 = vector.broadcast %21 : vector<8x1xf32> to vector<8x32xf32>
    %23 = arith.mulf %18, %22 : vector<8x32xf32>
    %24 = vector.shape_cast %3 : vector<32xf32> to vector<1x32xf32>
    %25 = vector.broadcast %24 : vector<1x32xf32> to vector<8x32xf32>
    %26 = arith.mulf %23, %25 : vector<8x32xf32>
    %27 = vector.shape_cast %5 : vector<32xf32> to vector<1x32xf32>
    %28 = vector.broadcast %27 : vector<1x32xf32> to vector<8x32xf32>
    %29 = arith.addf %26, %28 : vector<8x32xf32>
    %c0_10 = arith.constant 0 : index
    %c0_11 = arith.constant 0 : index
    %30 = vector.load %arg4[%c0_10, %c0_11] : memref<32x96xf32, #tpu.memory_space<vmem>>, vector<32x96xf32>
    %cst_12 = arith.constant dense<0.000000e+00> : vector<8x96xf32>
    %31 = tpu.matmul %29, %30, %cst_12 {dimension_numbers = #tpu.dot_dimension_numbers<[1], [0], [0], [1], [0, 0, 1, 1], [], []>} : vector<8x32xf32>, vector<32x96xf32>, vector<8x96xf32> -> vector<8x96xf32>
    %c0_13 = arith.constant 0 : index
    %c0_14 = arith.constant 0 : index
    %32 = vector.load %arg5[%c0_13, %c0_14] : memref<1x96xf32, #tpu.memory_space<vmem>>, vector<1x96xf32>
    %33 = vector.shape_cast %32 : vector<1x96xf32> to vector<96xf32>
    %34 = vector.shape_cast %33 : vector<96xf32> to vector<1x96xf32>
    %35 = vector.broadcast %34 : vector<1x96xf32> to vector<8x96xf32>
    %36 = arith.addf %31, %35 : vector<8x96xf32>
    %37 = vector.extract_strided_slice %36 {offsets = [0, 0], sizes = [8, 8], strides = [1, 1]} : vector<8x96xf32> to vector<8x8xf32>
    %38 = vector.extract_strided_slice %36 {offsets = [0, 8], sizes = [8, 8], strides = [1, 1]} : vector<8x96xf32> to vector<8x8xf32>
    %39 = vector.extract_strided_slice %36 {offsets = [0, 16], sizes = [8, 8], strides = [1, 1]} : vector<8x96xf32> to vector<8x8xf32>
    %40 = vector.extract_strided_slice %36 {offsets = [0, 24], sizes = [8, 8], strides = [1, 1]} : vector<8x96xf32> to vector<8x8xf32>
    %41 = vector.shape_cast %37 : vector<8x8xf32> to vector<1x8x8xf32>
    %42 = vector.shape_cast %38 : vector<8x8xf32> to vector<1x8x8xf32>
    %43 = vector.shape_cast %39 : vector<8x8xf32> to vector<1x8x8xf32>
    %44 = vector.shape_cast %40 : vector<8x8xf32> to vector<1x8x8xf32>
    %45 = tpu.concatenate %41, %42, %43, %44 in 0 : vector<1x8x8xf32>, vector<1x8x8xf32>, vector<1x8x8xf32>, vector<1x8x8xf32> -> vector<4x8x8xf32>
    %46 = vector.extract_strided_slice %36 {offsets = [0, 32], sizes = [8, 8], strides = [1, 1]} : vector<8x96xf32> to vector<8x8xf32>
    %47 = vector.extract_strided_slice %36 {offsets = [0, 40], sizes = [8, 8], strides = [1, 1]} : vector<8x96xf32> to vector<8x8xf32>
    %48 = vector.extract_strided_slice %36 {offsets = [0, 48], sizes = [8, 8], strides = [1, 1]} : vector<8x96xf32> to vector<8x8xf32>
    %49 = vector.extract_strided_slice %36 {offsets = [0, 56], sizes = [8, 8], strides = [1, 1]} : vector<8x96xf32> to vector<8x8xf32>
    %50 = vector.shape_cast %46 : vector<8x8xf32> to vector<1x8x8xf32>
    %51 = vector.shape_cast %47 : vector<8x8xf32> to vector<1x8x8xf32>
    %52 = vector.shape_cast %48 : vector<8x8xf32> to vector<1x8x8xf32>
    %53 = vector.shape_cast %49 : vector<8x8xf32> to vector<1x8x8xf32>
    %54 = tpu.concatenate %50, %51, %52, %53 in 0 : vector<1x8x8xf32>, vector<1x8x8xf32>, vector<1x8x8xf32>, vector<1x8x8xf32> -> vector<4x8x8xf32>
    %55 = vector.extract_strided_slice %36 {offsets = [0, 64], sizes = [8, 8], strides = [1, 1]} : vector<8x96xf32> to vector<8x8xf32>
    %56 = vector.extract_strided_slice %36 {offsets = [0, 72], sizes = [8, 8], strides = [1, 1]} : vector<8x96xf32> to vector<8x8xf32>
    %57 = vector.extract_strided_slice %36 {offsets = [0, 80], sizes = [8, 8], strides = [1, 1]} : vector<8x96xf32> to vector<8x8xf32>
    %58 = vector.extract_strided_slice %36 {offsets = [0, 88], sizes = [8, 8], strides = [1, 1]} : vector<8x96xf32> to vector<8x8xf32>
    %59 = vector.shape_cast %55 : vector<8x8xf32> to vector<1x8x8xf32>
    %60 = vector.shape_cast %56 : vector<8x8xf32> to vector<1x8x8xf32>
    %61 = vector.shape_cast %57 : vector<8x8xf32> to vector<1x8x8xf32>
    %62 = vector.shape_cast %58 : vector<8x8xf32> to vector<1x8x8xf32>
    %63 = tpu.concatenate %59, %60, %61, %62 in 0 : vector<1x8x8xf32>, vector<1x8x8xf32>, vector<1x8x8xf32>, vector<1x8x8xf32> -> vector<4x8x8xf32>
    "tpu.trace_start"() <{level = 10 : i32, message = "hqd,hkd->hqk"}> : () -> ()
    %cst_15 = arith.constant dense<0.000000e+00> : vector<4x8x8xf32>
    %64 = tpu.matmul %45, %54, %cst_15 {dimension_numbers = #tpu.dot_dimension_numbers<[2], [2], [1], [1], [0, 0, 0, 1, 1, 1], [0], [0]>} : vector<4x8x8xf32>, vector<4x8x8xf32>, vector<4x8x8xf32> -> vector<4x8x8xf32>
    "tpu.trace_stop"() : () -> ()
    %cst_16 = arith.constant 0.353553385 : f32
    %65 = vector.broadcast %cst_16 : f32 to vector<4x8x8xf32>
    %66 = arith.mulf %64, %65 : vector<4x8x8xf32>
    %cst_17 = arith.constant dense<0xFF800000> : vector<4x8xf32>
    %67 = vector.multi_reduction <maximumf>, %66, %cst_17 [2] : vector<4x8x8xf32> to vector<4x8xf32>
    %68 = vector.shape_cast %67 : vector<4x8xf32> to vector<4x8x1xf32>
    %69 = vector.broadcast %68 : vector<4x8x1xf32> to vector<4x8x8xf32>
    %70 = arith.subf %66, %69 : vector<4x8x8xf32>
    %71 = math.exp %70 : vector<4x8x8xf32>
    %cst_18 = arith.constant dense<0.000000e+00> : vector<4x8xf32>
    %72 = vector.multi_reduction <add>, %71, %cst_18 [2] : vector<4x8x8xf32> to vector<4x8xf32>
    %73 = vector.shape_cast %72 : vector<4x8xf32> to vector<4x8x1xf32>
    %74 = tpu.reciprocal %73 {approx = true} : vector<4x8x1xf32> -> vector<4x8x1xf32>
    %75 = vector.broadcast %74 : vector<4x8x1xf32> to vector<4x8x8xf32>
    %76 = arith.mulf %71, %75 : vector<4x8x8xf32>
    "tpu.trace_start"() <{level = 10 : i32, message = "hqk,hkd->hqd"}> : () -> ()
    %cst_19 = arith.constant dense<0.000000e+00> : vector<4x8x8xf32>
    %77 = tpu.matmul %76, %63, %cst_19 {dimension_numbers = #tpu.dot_dimension_numbers<[2], [1], [1], [2], [0, 0, 0, 1, 1, 2], [0], [0]>} : vector<4x8x8xf32>, vector<4x8x8xf32>, vector<4x8x8xf32> -> vector<4x8x8xf32>
    "tpu.trace_stop"() : () -> ()
    %78 = vector.extract_strided_slice %77 {offsets = [0, 0, 0], sizes = [1, 8, 8], strides = [1, 1, 1]} : vector<4x8x8xf32> to vector<1x8x8xf32>
    %79 = vector.shape_cast %78 : vector<1x8x8xf32> to vector<8x8xf32>
    %80 = vector.extract_strided_slice %77 {offsets = [1, 0, 0], sizes = [1, 8, 8], strides = [1, 1, 1]} : vector<4x8x8xf32> to vector<1x8x8xf32>
    %81 = vector.shape_cast %80 : vector<1x8x8xf32> to vector<8x8xf32>
    %82 = vector.extract_strided_slice %77 {offsets = [2, 0, 0], sizes = [1, 8, 8], strides = [1, 1, 1]} : vector<4x8x8xf32> to vector<1x8x8xf32>
    %83 = vector.shape_cast %82 : vector<1x8x8xf32> to vector<8x8xf32>
    %84 = vector.extract_strided_slice %77 {offsets = [3, 0, 0], sizes = [1, 8, 8], strides = [1, 1, 1]} : vector<4x8x8xf32> to vector<1x8x8xf32>
    %85 = vector.shape_cast %84 : vector<1x8x8xf32> to vector<8x8xf32>
    %86 = tpu.concatenate %79, %81, %83, %85 in 1 : vector<8x8xf32>, vector<8x8xf32>, vector<8x8xf32>, vector<8x8xf32> -> vector<8x32xf32>
    %c0_20 = arith.constant 0 : index
    %c0_21 = arith.constant 0 : index
    %87 = vector.load %arg6[%c0_20, %c0_21] : memref<32x32xf32, #tpu.memory_space<vmem>>, vector<32x32xf32>
    %cst_22 = arith.constant dense<0.000000e+00> : vector<8x32xf32>
    %88 = tpu.matmul %86, %87, %cst_22 {dimension_numbers = #tpu.dot_dimension_numbers<[1], [0], [0], [1], [0, 0, 1, 1], [], []>} : vector<8x32xf32>, vector<32x32xf32>, vector<8x32xf32> -> vector<8x32xf32>
    %c0_23 = arith.constant 0 : index
    %c0_24 = arith.constant 0 : index
    %89 = vector.load %arg7[%c0_23, %c0_24] : memref<1x32xf32, #tpu.memory_space<vmem>>, vector<1x32xf32>
    %90 = vector.shape_cast %89 : vector<1x32xf32> to vector<32xf32>
    %91 = vector.shape_cast %90 : vector<32xf32> to vector<1x32xf32>
    %92 = vector.broadcast %91 : vector<1x32xf32> to vector<8x32xf32>
    %93 = arith.addf %88, %92 : vector<8x32xf32>
    %94 = arith.addf %1, %93 : vector<8x32xf32>
    %c0_25 = arith.constant 0 : index
    %c0_26 = arith.constant 0 : index
    %95 = vector.load %arg8[%c0_25, %c0_26] : memref<1x32xf32, #tpu.memory_space<vmem>>, vector<1x32xf32>
    %96 = vector.shape_cast %95 : vector<1x32xf32> to vector<32xf32>
    %c0_27 = arith.constant 0 : index
    %c0_28 = arith.constant 0 : index
    %97 = vector.load %arg9[%c0_27, %c0_28] : memref<1x32xf32, #tpu.memory_space<vmem>>, vector<1x32xf32>
    %98 = vector.shape_cast %97 : vector<1x32xf32> to vector<32xf32>
    %cst_29 = arith.constant dense<0.000000e+00> : vector<8xf32>
    %99 = vector.multi_reduction <add>, %94, %cst_29 [1] : vector<8x32xf32> to vector<8xf32>
    %100 = vector.shape_cast %99 : vector<8xf32> to vector<8x1xf32>
    %cst_30 = arith.constant 3.200000e+01 : f32
    %101 = vector.broadcast %cst_30 : f32 to vector<8x1xf32>
    %102 = arith.divf %100, %101 : vector<8x1xf32>
    %103 = vector.broadcast %102 : vector<8x1xf32> to vector<8x32xf32>
    %104 = arith.subf %94, %103 : vector<8x32xf32>
    %105 = arith.mulf %104, %104 : vector<8x32xf32>
    %cst_31 = arith.constant dense<0.000000e+00> : vector<8xf32>
    %106 = vector.multi_reduction <add>, %105, %cst_31 [1] : vector<8x32xf32> to vector<8xf32>
    %107 = vector.shape_cast %106 : vector<8xf32> to vector<8x1xf32>
    %cst_32 = arith.constant 3.200000e+01 : f32
    %108 = vector.broadcast %cst_32 : f32 to vector<8x1xf32>
    %109 = arith.divf %107, %108 : vector<8x1xf32>
    %110 = vector.broadcast %102 : vector<8x1xf32> to vector<8x32xf32>
    %111 = arith.subf %94, %110 : vector<8x32xf32>
    %cst_33 = arith.constant 9.99999974E-6 : f32
    %112 = vector.broadcast %cst_33 : f32 to vector<8x1xf32>
    %113 = arith.addf %109, %112 : vector<8x1xf32>
    %114 = math.rsqrt %113 : vector<8x1xf32>
    %115 = vector.broadcast %114 : vector<8x1xf32> to vector<8x32xf32>
    %116 = arith.mulf %111, %115 : vector<8x32xf32>
    %117 = vector.shape_cast %96 : vector<32xf32> to vector<1x32xf32>
    %118 = vector.broadcast %117 : vector<1x32xf32> to vector<8x32xf32>
    %119 = arith.mulf %116, %118 : vector<8x32xf32>
    %120 = vector.shape_cast %98 : vector<32xf32> to vector<1x32xf32>
    %121 = vector.broadcast %120 : vector<1x32xf32> to vector<8x32xf32>
    %122 = arith.addf %119, %121 : vector<8x32xf32>
    %c0_34 = arith.constant 0 : index
    %c0_35 = arith.constant 0 : index
    %123 = vector.load %arg10[%c0_34, %c0_35] : memref<32x64xf32, #tpu.memory_space<vmem>>, vector<32x64xf32>
    %cst_36 = arith.constant dense<0.000000e+00> : vector<8x64xf32>
    %124 = tpu.matmul %122, %123, %cst_36 {dimension_numbers = #tpu.dot_dimension_numbers<[1], [0], [0], [1], [0, 0, 1, 1], [], []>} : vector<8x32xf32>, vector<32x64xf32>, vector<8x64xf32> -> vector<8x64xf32>
    %c0_37 = arith.constant 0 : index
    %c0_38 = arith.constant 0 : index
    %125 = vector.load %arg11[%c0_37, %c0_38] : memref<1x64xf32, #tpu.memory_space<vmem>>, vector<1x64xf32>
    %126 = vector.shape_cast %125 : vector<1x64xf32> to vector<64xf32>
    %127 = vector.shape_cast %126 : vector<64xf32> to vector<1x64xf32>
    %128 = vector.broadcast %127 : vector<1x64xf32> to vector<8x64xf32>
    %129 = arith.addf %124, %128 : vector<8x64xf32>
    %cst_39 = arith.constant 0.000000e+00 : f32
    %130 = vector.broadcast %cst_39 : f32 to vector<8x64xf32>
    %131 = arith.maximumf %129, %130 : vector<8x64xf32>
    %c0_40 = arith.constant 0 : index
    %c0_41 = arith.constant 0 : index
    %132 = vector.load %arg12[%c0_40, %c0_41] : memref<64x32xf32, #tpu.memory_space<vmem>>, vector<64x32xf32>
    %cst_42 = arith.constant dense<0.000000e+00> : vector<8x32xf32>
    %133 = tpu.matmul %131, %132, %cst_42 {dimension_numbers = #tpu.dot_dimension_numbers<[1], [0], [0], [1], [0, 0, 1, 1], [], []>} : vector<8x64xf32>, vector<64x32xf32>, vector<8x32xf32> -> vector<8x32xf32>
    %c0_43 = arith.constant 0 : index
    %c0_44 = arith.constant 0 : index
    %134 = vector.load %arg13[%c0_43, %c0_44] : memref<1x32xf32, #tpu.memory_space<vmem>>, vector<1x32xf32>
    %135 = vector.shape_cast %134 : vector<1x32xf32> to vector<32xf32>
    %136 = vector.shape_cast %135 : vector<32xf32> to vector<1x32xf32>
    %137 = vector.broadcast %136 : vector<1x32xf32> to vector<8x32xf32>
    %138 = arith.addf %133, %137 : vector<8x32xf32>
    %139 = arith.addf %94, %138 : vector<8x32xf32>
    %c0_45 = arith.constant 0 : index
    %c0_46 = arith.constant 0 : index
    %c0_47 = arith.constant 0 : index
    %140 = vector.load %arg14[%c0_45, %c0_46, %c0_47] : memref<1x8x32xf32, #tpu.memory_space<vmem>>, vector<1x8x32xf32>
    %141 = vector.shape_cast %140 : vector<1x8x32xf32> to vector<8x32xf32>
    %142 = vector.shape_cast %139 : vector<8x32xf32> to vector<1x8x32xf32>
    tpu.vector_store %arg14[%c0_45, %c0_46, %c0_47], %142 {strides = array<i32>} : memref<1x8x32xf32, #tpu.memory_space<vmem>>, vector<1x8x32xf32>,
    return
  }
  func.func @transform_0(%arg0: i32) -> (i32, i32, i32) {
    %c0_i32 = arith.constant 0 : i32
    %c0_i32_0 = arith.constant 0 : i32
    %c0_i32_1 = arith.constant 0 : i32
    return %arg0, %c0_i32, %c0_i32_0 : i32, i32, i32
  }
  func.func @transform_1(%arg0: i32) -> (i32, i32) {
    %c0_i32 = arith.constant 0 : i32
    %c0_i32_0 = arith.constant 0 : i32
    %c0_i32_1 = arith.constant 0 : i32
    return %c0_i32, %c0_i32_0 : i32, i32
  }
  func.func @transform_2(%arg0: i32) -> (i32, i32) {
    %c0_i32 = arith.constant 0 : i32
    %c0_i32_0 = arith.constant 0 : i32
    %c0_i32_1 = arith.constant 0 : i32
    return %c0_i32, %c0_i32_0 : i32, i32
  }
  func.func @transform_3(%arg0: i32) -> (i32, i32) {
    %c0_i32 = arith.constant 0 : i32
    %c0_i32_0 = arith.constant 0 : i32
    %c0_i32_1 = arith.constant 0 : i32
    return %c0_i32, %c0_i32_0 : i32, i32
  }
  func.func @transform_4(%arg0: i32) -> (i32, i32) {
    %c0_i32 = arith.constant 0 : i32
    %c0_i32_0 = arith.constant 0 : i32
    %c0_i32_1 = arith.constant 0 : i32
    return %c0_i32, %c0_i32_0 : i32, i32
  }
  func.func @transform_5(%arg0: i32) -> (i32, i32) {
    %c0_i32 = arith.constant 0 : i32
    %c0_i32_0 = arith.constant 0 : i32
    %c0_i32_1 = arith.constant 0 : i32
    return %c0_i32, %c0_i32_0 : i32, i32
  }
  func.func @transform_6(%arg0: i32) -> (i32, i32) {
    %c0_i32 = arith.constant 0 : i32
    %c0_i32_0 = arith.constant 0 : i32
    %c0_i32_1 = arith.constant 0 : i32
    return %c0_i32, %c0_i32_0 : i32, i32
  }
  func.func @transform_7(%arg0: i32) -> (i32, i32) {
    %c0_i32 = arith.constant 0 : i32
    %c0_i32_0 = arith.constant 0 : i32
    %c0_i32_1 = arith.constant 0 : i32
    return %c0_i32, %c0_i32_0 : i32, i32
  }
  func.func @transform_8(%arg0: i32) -> (i32, i32) {
    %c0_i32 = arith.constant 0 : i32
    %c0_i32_0 = arith.constant 0 : i32
    %c0_i32_1 = arith.constant 0 : i32
    return %c0_i32, %c0_i32_0 : i32, i32
  }
  func.func @transform_9(%arg0: i32) -> (i32, i32) {
    %c0_i32 = arith.constant 0 : i32
    %c0_i32_0 = arith.constant 0 : i32
    %c0_i32_1 = arith.constant 0 : i32
    return %c0_i32, %c0_i32_0 : i32, i32
  }
  func.func @transform_10(%arg0: i32) -> (i32, i32) {
    %c0_i32 = arith.constant 0 : i32
    %c0_i32_0 = arith.constant 0 : i32
    %c0_i32_1 = arith.constant 0 : i32
    return %c0_i32, %c0_i32_0 : i32, i32
  }
  func.func @transform_11(%arg0: i32) -> (i32, i32) {
    %c0_i32 = arith.constant 0 : i32
    %c0_i32_0 = arith.constant 0 : i32
    %c0_i32_1 = arith.constant 0 : i32
    return %c0_i32, %c0_i32_0 : i32, i32
  }
  func.func @transform_12(%arg0: i32) -> (i32, i32) {
    %c0_i32 = arith.constant 0 : i32
    %c0_i32_0 = arith.constant 0 : i32
    %c0_i32_1 = arith.constant 0 : i32
    return %c0_i32, %c0_i32_0 : i32, i32
  }
  func.func @transform_13(%arg0: i32) -> (i32, i32, i32) {
    %c0_i32 = arith.constant 0 : i32
    %c0_i32_0 = arith.constant 0 : i32
    %c0_i32_1 = arith.constant 0 : i32
    return %arg0, %c0_i32, %c0_i32_0 : i32, i32, i32
  }
}

</mosaic_0001>

<bundles_post_ra>
// kernel: tpu_custom_call.1
= control target key start
LH: loop header
LB: loop body
LE: loop exit
PB: predicated region body
PF: predicated region fallthrough
CT: control target
= control target key end

     0   :  { %s1683_s0 = inlined_call_operand.hbm [shape: f32[2,8,32], index: 0, kind: input, shape index: {}]   ;;  %s1684_s1 = inlined_call_operand.hbm [shape: f32[1,32], index: 1, kind: input, shape index: {}]   ;;  %s1685_s2 = inlined_call_operand.vmem [shape: f32[1,32], index: 2, kind: input, shape index: {}]   ;;  %s1686_s3 = inlined_call_operand.vmem [shape: f32[32,96], index: 3, kind: input, shape index: {}]   ;;  %s1687_s4 = inlined_call_operand.vmem [shape: f32[1,96], index: 4, kind: input, shape index: {}]   ;;  %s1688_s5 = inlined_call_operand.vmem [shape: f32[32,32], index: 5, kind: input, shape index: {}]   ;;  %s1689_s6 = inlined_call_operand.vmem [shape: f32[1,32], index: 6, kind: input, shape index: {}]   ;;  %s1690_s7 = inlined_call_operand.vmem [shape: f32[1,32], index: 7, kind: input, shape index: {}]   ;;  %s1691_s8 = inlined_call_operand.vmem [shape: f32[1,32], index: 8, kind: input, shape index: {}]   ;;  %s1692_s9 = inlined_call_operand.vmem [shape: f32[32,64], index: 9, kind: input, shape index: {}]   ;;  %s1693_s10 = inlined_call_operand.vmem [shape: f32[1,64], index: 10, kind: input, shape index: {}]   ;;  %s1694_s11 = inlined_call_operand.vmem [shape: f32[64,32], index: 11, kind: input, shape index: {}]   ;;  %s1695_s12 = inlined_call_operand.vmem [shape: f32[1,32], index: 12, kind: input, shape index: {}]   ;;  %s1696_s13 = inlined_call_operand.hbm [shape: f32[2,8,32], index: 13, kind: output, shape index: {}]  }
   0x1   :  { %1704 = sst [smem:[#allocation17_spill]] %s1684_s1 }
   0x2   :  { %18 = vsyncpa [#allocation3], 0 }
   0x3   :  { %20 = vsyncpa [#allocation3 + $0x1], 0 }
   0x4   :  { %21 = vsyncpa [#allocation6], 0 }
   0x5   :  { %22 = vsyncpa [#allocation4], 0 }
   0x6   :  { %24 = vsyncpa [#allocation4 + $0x1], 0  ;;  %s1399_s25 = smov 0   ;;  %s1401_s26 = smov 0  }
   0x7   :  { %s1403_s27 = smov 0   ;;  %s1405_s28 = smov 0  }
   0x8 LB: > { %1705 = sst [smem:[#allocation11_spill]] %s1305_s25  ;;  %s1420_s29 = sadd.s32 4294967295, %s1317_s28   ;;  %s1317_s28 = sphi %s1405_s28, %s1721_s28   ;;  %s1313_s27 = sphi %s1403_s27, %s1723_s27   ;;  %s1309_s26 = sphi %s1401_s26, %s1725_s26   ;;  %s1305_s25 = sphi %s1399_s25, %s1724_s25  }
   0x9   : > { %1706 = sst [smem:[#allocation12_spill]] %s1313_s27  ;;  %s1056_s30 = sadd.s32 4294967294, %s1317_s28  }
   0xa   : > { %p50_p0 = scmp.ne.s32.totalorder %s1309_s26, %s1305_s25  ;;  %p51_p1 = scmp.eq.s32.totalorder %s1420_s29, 0 }
   0xb   : > { %p326_p2 = scmp.eq.s32.totalorder %s1420_s29, 1  ;;  %p332_p3 = scmp.eq.s32.totalorder %s1056_s30, 1 }
   0xc   : > { %p1429_p4 = por %p51_p1, %p50_p0  ;;  %p1057_p5 = scmp.ge.s32.totalorder %s1317_s28, 1 }
   0xd   : > { %p1434_p6 = por %p332_p3, %p50_p0  ;;  %p339_p7 = scmp.lt.s32.totalorder %s1317_s28, 3 }
   0xe   : > { %s1710_s1 = sld [smem:[#allocation17_spill]]  ;;  %s1319_s20 = smov [#allocation5]  }
   0xf   : > { %s1708_s15 = scalar_select %p1434_p6, 1, 0 }
  0x10   : > { %p1442_p8 = pnand %p1057_p5, %p339_p7  ;;  %s353_s21 = sshll.u32 %s1319_s20, 4  ;;  %s354_s21 = int_to_ptr.vmem [resolvable:$true] %s353_s21 }
  0x11   : > { %1709 = sst [smem:[#allocation13_spill]] %s1708_s15  ;;  %s1452_s22 = sadd.s32 1, %s1317_s28  }
  0x12   : > { %p1094_p10 = pneg %p1442_p8  ;;  %1712 = sst [smem:[#allocation14_spill]] %s1452_s22 }
  0x13   : > { %s37_s23 = sadd.s32 1, %s1313_s27  ;;  %s34_s24 = ssub.s32 %s1317_s28, %s1452_s22 }
  0x14   : > { %s351_s18 = sshll.u32 %s1710_s1, 4  ;;  %p1095_p11 = pnand %p1094_p10, %p51_p1  ;;  %s352_s18 = int_to_ptr.hbm [resolvable:$true] %s351_s18 }
  0x15   : > { %p35_p12 = scmp.eq.s32.totalorder %s34_s24, 0  ;;  %p44_p13 = scmp.ne.s32.totalorder %s1313_s27, %s1309_s26 }
  0x16   : > { %1097 = dma.hbm_to_vmem [thread:$0]  (!%p1095_p11), %s352_s18, 16, %s354_s21, [#allocation6]  }
  0x17   : > { %p45_p0 = scmp.eq.s32.totalorder %s1317_s28, 0  ;;  %p1465_p3 = por %p326_p2, %p44_p13 }
  0x18   : > { %s1461_s30 = scalar_select %p35_p12, %s1313_s27, %s37_s23  }
  0x19   : > { %s1714_s16 = scalar_select %p1465_p3, 1, 0 }
  0x1a   : > { %1713 = sst [smem:[#allocation15_spill]] %s1461_s30  ;;  %p1107_p5 = scmp.lt.s32.totalorder %s1317_s28, 2 }
  0x1b   : > { %1715 = sst [smem:[#allocation16_spill]] %s1714_s16  ;;  %s397_s17 = sand.u32 1, %s1313_s27  }
  0x1c   : > { %s1061_s20 = sshll.u32 %s1317_s28, 3  ;;  %p46_p7 = por %p45_p0, %p44_p13 }
  0x1d   : > { %s1060_s1 = sshll.u32 %s397_s17, 3  ;;  %s405_s22 = scalar_lea.hbm %s1683_s0, %s1061_s20 }
  0x1e   : > { %s407_s18 = sshll.u32 %s405_s22, 4  ;;  %s401_s21 = scalar_lea.vmem [#allocation2], %s1060_s1  ;;  %s408_s18 = int_to_ptr.hbm [resolvable:$true] %s407_s18 }
  0x1f   : > { %s409_s24 = sshll.u32 %s401_s21, 4  ;;  %p1475_p10 = pnand %p1107_p5, %p46_p7  ;;  %s410_s24 = int_to_ptr.vmem [resolvable:$true] %s409_s24 }
  0x20   : > { %s398_s30 = scalar_lea.sflag [#allocation3], %s397_s17  ;;  %s1217_s16 = sshra.s32 %s408_s18, 4  ;;  %s1218_s16 = int_to_ptr.hbm [resolvable:$true] %s1217_s16 }
  0x21   : > { %s1219_s27 = scalar_lea.hbm %s1218_s16, 8  ;;  %p1221_p11 = pneg %p1475_p10 }
  0x22   : > { %p1220_p2 = scmp.ne.s32.totalorder %s1218_s16, %s1219_s27  ;;  %s1224_s1 = scalar_lea.hbm %s1683_s0, 16 }
  0x23   : > { %p1225_p0 = scmp.lt.s32.totalorder %s1218_s16, %s1683_s0  ;;  %p1226_p5 = scmp.lt.s32.totalorder %s1224_s1, %s1219_s27 }
  0x24   : > { %p1222_p12 = pnand %p1221_p11, %p1220_p2 }
  0x25   : > { %p1227_p7 = por %p1226_p5, %p1225_p0 }
  0x26   : > { %p1223_p13 = pneg %p1222_p12 }
  0x28   : > { %p1228_p9 = pnand %p1227_p7, %p1223_p13 }
  0x2a   : > { %1231 = shalt.err (!%p1228_p9)
}
  0x2b   : > { %1101 = dma.hbm_to_vmem [thread:$0]  (!%p1475_p10), %s408_s18, 128, %s410_s24, %s398_s30  }
  0x2c   : > { %418 = sbr.rel (%p1442_p8) target bundleno = 2001 (0x7d1), region = 72  ;;  %s1492_s17 = sand.u32 (!%p1442_p8), 1, %s1309_s26  }
  0x2d   : > { %s1063_s21 = sshll.u32 (!%p1442_p8), %s1492_s17, 3  ;;  %s421_s25 = scalar_lea.sflag (!%p1442_p8), [#allocation3], %s1492_s17 }
  0x2e   : > { %s424_s27 = scalar_lea.vmem (!%p1442_p8), [#allocation2], %s1063_s21 }
  0x31   : > { %1292 = dma.done.wait (%p1429_p4), %s421_s25, 128  }
  0x32   : > { %1294 = vsyncadd (%p1429_p4), %s421_s25, 4294967168 }
  0x33   : > { %1296 = dma.done.wait (%p51_p1), [#allocation6], 16  }
  0x34   : > { %1298 = vsyncadd (%p51_p1), [#allocation6], 4294967280  ;;  %vm476_vm0 = vcmask 261120   ;;  %v1506_v0 = vld [vmem:[%s424_s27] sm:$0xff]  ;;  %v1320_v2 = vmov 32.0   ;;  %v517_v14 = vld [vmem:[%s1686_s3 + $0x18] sm:$0xff] }
  0x35   : > { %v477_v1 = vsel %vm476_vm0, %v1506_v0, 0.0  ;;  %1165 = vrcp.f32 %v1320_v2  ;;  %537 = vmatpush.msra.mxu0 %v517_v14  ;;  %v516_v15 = vld [vmem:[%s1686_s3 + $0x10] sm:$0xff]  ;;  %v515_v16 = vld [vmem:[%s1686_s3 + $0x8] sm:$0xff]  ;;  %v514_v17 = vld [vmem:[%s1686_s3] sm:$0xff]  ;;  %s1321_s27 = smov 104   ;;  %s1322_s14 = smov 120  }
  0x36   : > { %478 = vadd.xlane.f32.xlu0 %v477_v1  ;;  %v1157_v27 = vld [vmem:[#allocation5] ss:$0 sm:$0xff]  ;;  %v1158_v30 = vld [vmem:[%s1685_s2] ss:$0 sm:$0xff]  ;;  %s1323_s19 = smov 112   ;;  %s1324_s30 = smov 96  }
  0x37   : > { %538 = vmatpush.msra.mxu0 %v516_v15  ;;  %v1159_v33 = vld [vmem:[%s1687_s4] ss:$0 sm:$0xff]  ;;  %vm554_vm5 = vcmask 64512   ;;  %s1325_s16 = smov 64   ;;  %s1326_s18 = smov 8   ;;  %vm822_vm6 = vcmask 130048  }
  0x38   : > { %s1327_s24 = smov 16   ;;  %s1328_s23 = smov 24   ;;  %vm824_vm7 = vcmask 195584   ;;  %vm934_vm11 = vcmask 523264  }
  0x39   : > { %539 = vmatpush.msra.mxu0 %v515_v16  ;;  %s1083_s1 = sshll.u32 %s1420_s29, 3  ;;  %s961_s29 = scalar_lea.sflag [#allocation4], %s1492_s17 }
  0x3b   : > { %v1166_v3 = vpop.eup %1165  ;;  %540 = vmatpush.msra.mxu0 %v514_v17 }
  0x3c   : > { %v481_v4 = vmul.f32 32.0, %v1166_v3  ;;  %vm485_vm1 = vweird.f32 %v1166_v3 }
  0x3e   : > { %v482_v5 = vsub.f32 1.0, %v481_v4 }
  0x40   : > { %v483_v6 = vmul.f32 %v1166_v3, %v482_v5 }
  0x42   : > { %v484_v7 = vadd.f32 %v1166_v3, %v483_v6 }
  0x44   : > { %v1510_v8 = vsel %vm485_vm1, %v1166_v3, %v484_v7 }
  0xa9   : > { %v479_v9 = vpop.xlane.xlu0 %478 }
  0xaa   : > { %v487_v10 = vmul.f32 %v1510_v8, %v479_v9 }
  0xac   : > { %v488_v11 = vsub.f32 %v1506_v0, %v487_v10 }
  0xae   : > { %v489_v12 = vmul.f32 %v488_v11, %v488_v11 }
  0xb0   : > { %v490_v13 = vsel %vm476_vm0, %v489_v12, 0.0 }
  0xb1   : > { %491 = vadd.xlane.f32.xlu0 %v490_v13 }
 0x124   : > { %v492_v18 = vpop.xlane.xlu0 %491 }
 0x125   : > { %v493_v19 = vmul.f32 %v492_v18, %v1510_v8 }
 0x127   : > { %v494_v20 = vadd.f32 1e-05, %v493_v19 }
 0x129   : > { %1167 = vrsqrt.f32 %v494_v20  ;;  %vm501_vm3 = vweird.f32 %v494_v20 }
 0x12f   : > { %v1168_v21 = vpop.eup %1167 }
 0x130   : > { %v496_v22 = vmul.f32 %v1168_v21, %v494_v20  ;;  %vm502_vm2 = vweird.f32 %v1168_v21 }
 0x131   : > { %vm503_vm4 = vmor %vm501_vm3, %vm502_vm2 }
 0x132   : > { %v497_v23 = vmul.f32 %v1168_v21, %v496_v22 }
 0x134   : > { %v498_v24 = vmul.f32 0.5, %v497_v23 }
 0x136   : > { %v499_v25 = vsub.f32 1.5, %v498_v24 }
 0x138   : > { %v500_v26 = vmul.f32 %v1168_v21, %v499_v25 }
 0x13a   : > { %v504_v28 = vsel %vm503_vm4, %v1168_v21, %v500_v26 }
 0x13b   : > { %v505_v29 = vmul.f32 %v504_v28, %v488_v11 }
 0x13d   : > { %v509_v31 = vmul.f32 %v1157_v27, %v505_v29 }
 0x13f   : > { %v513_v32 = vadd.f32 %v1158_v30, %v509_v31 }
 0x141   : > { %1066 = vmatmul.msk.f32.vlgmr.msra.gmra.mxu0 %vm476_vm0, %v513_v32 }
 0x1be   : > { %v542_v34 = vpop.f32.mrf.mxu0 }
 0x1bf   : > { %v1535_v35 = vadd.f32 %v1159_v33, %v542_v34  ;;  %v829_v34 = vld [vmem:[%s1688_s5 + $0x18] sm:$0xff] }
 0x1c1   : > { %550 = vrot.lane.b32.xlu2 %v1535_v35, %s1321_s27  ;;  %546 = vrot.lane.b32.xlu1 %v1535_v35, %s1322_s14 }
 0x1c9   : > { %548 = vrot.lane.b32.xlu1 %v1535_v35, %s1323_s19  ;;  %s971_s19 = scalar_lea.hbm %s1696_s13, %s1083_s1 }
 0x1d1   : > { %552 = vrot.lane.b32.xlu1 %v1535_v35, %s1324_s30 }
 0x21b   : > { %v1541_v37 = vpop.permute.xlu2 %550 }
 0x233   : > { %v547_v36 = vpop.permute.xlu1 %546 }
 0x234   : > { %579 = vrot.lane.b32.xlu2 %v547_v36, %s1324_s30 }
 0x23b   : > { %v549_v38 = vpop.permute.xlu1 %548 }
 0x23c   : > { %631 = vrot.lane.b32.xlu2 %v1541_v37, %s1324_s30  ;;  %605 = vrot.lane.b32.xlu0 %v549_v38, %s1324_s30  ;;  %v1152_v50 = vpack.i.bf16 %v549_v38, %v547_v36  ;;  %s472_s30 = scalar_lea.vmem [#allocation7], %s1063_s21  ;;  %s1267_s21 = scalar_lea.hbm %s1696_s13, 16 }
 0x243   : > { %v553_v39 = vpop.permute.xlu1 %552 }
 0x244   : > { %1067 = vmatpush.xpose.msk.msra.mxu1 %vm554_vm5, %v553_v39 }
 0x247   : > { %1068 = vmatmul.msk.f32.vlgmr.msra.gmra.mxu1 %vm554_vm5, %v1535_v35 }
 0x28e   : > { %v580_v40 = vpop.permute.xlu2 %579 }
 0x28f   : > { %1069 = vmatpush.xpose.msk.msra.mxu2 %vm554_vm5, %v580_v40 }
 0x292   : > { %1070 = vmatmul.msk.f32.vlgmr.msra.gmra.mxu2 %vm554_vm5, %v547_v36  ;;  %v827_v36 = vld [vmem:[%s1688_s5 + $0x8] sm:$0xff] }
 0x296   : > { %v632_v41 = vpop.permute.xlu2 %631 }
 0x297   : > { %1073 = vmatpush.xpose.msk.msrb.mxu1 %vm554_vm5, %v632_v41 }
 0x29a   : > { %1074 = vmatmul.msk.f32.vlgmr.msrb.gmra.mxu1 %vm554_vm5, %v1541_v37 }
 0x2ae   : > { %v606_v42 = vpop.permute.xlu0 %605 }
 0x2af   : > { %1071 = vmatpush.xpose.msk.msra.mxu3 %vm554_vm5, %v606_v42 }
 0x2b2   : > { %1072 = vmatmul.msk.f32.vlgmr.msra.gmra.mxu3 %vm554_vm5, %v549_v38 }
 0x2c4   : > { %v576_v43 = vpop.f32.mrf.mxu1 }
 0x2c5   : > { %v657_v54 = vmul.f32 0.35355338, %v576_v43 }
 0x2c7   : > { %v661_v55 = vsel %vm554_vm5, %v657_v54, -inf }
 0x315   : > { %v602_v44 = vpop.f32.mrf.mxu2 }
 0x316   : > { %v658_v45 = vmul.f32 0.35355338, %v602_v44 }
 0x317   : > { %v654_v46 = vpop.f32.mrf.mxu1 }
 0x318   : > { %v660_v47 = vmul.f32 0.35355338, %v654_v46  ;;  %v664_v48 = vsel %vm554_vm5, %v658_v45, -inf }
 0x319   : > { %665 = vmax.xlane.f32.xlu1 %v664_v48 }
 0x31a   : > { %v670_v49 = vsel %vm554_vm5, %v660_v47, -inf }
 0x31b   : > { %671 = vmax.xlane.f32.xlu0 %v670_v49 }
 0x32f   : > { %1153 = vrot.lane.b32.xlu0 %v1152_v50, %s1325_s16 }
 0x335   : > { %v628_v51 = vpop.f32.mrf.mxu3 }
 0x336   : > { %v659_v52 = vmul.f32 0.35355338, %v628_v51 }
 0x338   : > { %v667_v53 = vsel %vm554_vm5, %v659_v52, -inf }
 0x339   : > { %668 = vmax.xlane.f32.xlu2 %v667_v53 }
 0x341   : > { %662 = vmax.xlane.f32.xlu2 %v661_v55  ;;  %v893_v55 = vld [vmem:[%s1692_s9 + $0x18] sm:$0xff] }
 0x38c   : > { %v666_v56 = vpop.xlane.xlu1 %665 }
 0x38d   : > { %v674_v59 = vsub.f32 %v658_v45, %v666_v56  ;;  %v1160_v45 = vld [vmem:[%s1689_s6] ss:$0 sm:$0xff]  ;;  %v891_v56 = vld [vmem:[%s1692_s9 + $0x8] sm:$0xff] }
 0x38e   : > { %v672_v57 = vpop.xlane.xlu0 %671 }
 0x38f   : > { %v676_v58 = vsub.f32 %v660_v47, %v672_v57  ;;  %v679_v61 = vmul.f32 1.442695, %v674_v59  ;;  %v890_v57 = vld [vmem:[%s1692_s9] sm:$0xff]  ;;  %v928_v59 = vld [vmem:[%s1694_s11 + $0x30] sm:$0xff] }
 0x391   : > { %v683_v60 = vmul.f32 1.442695, %v676_v58  ;;  %v929_v58 = vld [vmem:[%s1694_s11 + $0x38] sm:$0xff] }
 0x392   : > { %946 = vmatpush.msrb.mxu0 %v929_v58 }
 0x393   : > { %1169 = vpow2.f32 %v683_v60  ;;  %v927_v60 = vld [vmem:[%s1694_s11 + $0x28] sm:$0xff] }
 0x394   : > { %1171 = vpow2.f32 %v679_v61  ;;  %947 = vmatpush.msrb.mxu0 %v928_v59 }
 0x396   : > { %948 = vmatpush.msrb.mxu0 %v927_v60 }
 0x399   : > { %v1170_v62 = vpop.eup %1169 }
 0x39a   : > { %v694_v63 = vsel %vm554_vm5, %v1170_v62, 0.0  ;;  %v1172_v1 = vpop.eup %1171 }
 0x39b   : > { %695 = vadd.xlane.f32.xlu1 %v694_v63  ;;  %v688_v4 = vsel %vm554_vm5, %v1172_v1, 0.0  ;;  %v926_v63 = vld [vmem:[%s1694_s11 + $0x20] sm:$0xff] }
 0x39c   : > { %949 = vmatpush.msrb.mxu0 %v926_v63 }
 0x3a1   : > { %v1154_v2 = vpop.permute.xlu0 %1153 }
 0x3a2   : > { %v1156_v3 = vunpack.i.h.bf16 %v1154_v2  ;;  %v1155_v5 = vunpack.i.l.bf16 %v1154_v2  ;;  %v925_v2 = vld [vmem:[%s1694_s11 + $0x18] sm:$0xff] }
 0x3a3   : > { %689 = vadd.xlane.f32.xlu1 %v688_v4  ;;  %950 = vmatpush.msrb.mxu0 %v925_v2 }
 0x3a4   : > { %752 = vmatpush.msrb.mxu3 %v1155_v5  ;;  %778 = vmatpush.msra.mxu1 %v1156_v3 }
 0x3a6   : > { %913 = vmatpush.msra.mxu3 %v893_v55 }
 0x3ac   : > { %v669_v6 = vpop.xlane.xlu2 %668 }
 0x3ad   : > { %v675_v7 = vsub.f32 %v659_v52, %v669_v6 }
 0x3af   : > { %v681_v9 = vmul.f32 1.442695, %v675_v7 }
 0x3b1   : > { %1173 = vpow2.f32 %v681_v9  ;;  %v1161_v9 = vld [vmem:[%s1690_s7] ss:$0 sm:$0xff] }
 0x3b4   : > { %v663_v10 = vpop.xlane.xlu2 %662 }
 0x3b5   : > { %v673_v11 = vsub.f32 %v657_v54, %v663_v10 }
 0x3b7   : > { %v1174_v12 = vpop.eup %1173  ;;  %v677_v13 = vmul.f32 1.442695, %v673_v11 }
 0x3b8   : > { %v691_v14 = vsel %vm554_vm5, %v1174_v12, 0.0 }
 0x3b9   : > { %1175 = vpow2.f32 %v677_v13  ;;  %692 = vadd.xlane.f32.xlu2 %v691_v14 }
 0x3bf   : > { %v1176_v15 = vpop.eup %1175 }
 0x3c0   : > { %v685_v16 = vsel %vm554_vm5, %v1176_v15, 0.0 }
 0x3c1   : > { %686 = vadd.xlane.f32.xlu1 %v685_v16  ;;  %v923_v16 = vld [vmem:[%s1694_s11 + $0x8] sm:$0xff] }
 0x3d1   : > { %783 = vrot.lane.b32.xlu2 %v1541_v37, %s1325_s16  ;;  %v826_v37 = vld [vmem:[%s1688_s5] sm:$0xff] }
 0x3da   : > { %705 = vrot.lane.b32.xlu1 %v1535_v35, %s1325_s16  ;;  %v828_v35 = vld [vmem:[%s1688_s5 + $0x10] sm:$0xff]  ;;  %s973_s16 = sshll.u32 %s472_s30, 4  ;;  %s974_s16 = int_to_ptr.vmem [resolvable:$true] %s973_s16 }
 0x40e   : > { %v696_v17 = vpop.xlane.xlu1 %695 }
 0x416   : > { %v690_v18 = vpop.xlane.xlu1 %689 }
 0x417   : > { %1177 = vrcp.f32 %v690_v18  ;;  %v1163_v18 = vld [vmem:[%s1693_s10] ss:$0 sm:$0xff] }
 0x41d   : > { %v1178_v19 = vpop.eup %1177 }
 0x41e   : > { %v702_v20 = vmul.f32 %v1178_v19, %v1172_v1 }
 0x420   : > { %1076 = vmatmul.msk.f32.vlgmr.msrb.gmra.mxu3 %vm554_vm5, %v702_v20 }
 0x42c   : > { %v693_v21 = vpop.xlane.xlu2 %692 }
 0x42d   : > { %1179 = vrcp.f32 %v693_v21 }
 0x42e   : > { %1181 = vrcp.f32 %v696_v17  ;;  %v922_v17 = vld [vmem:[%s1694_s11] sm:$0xff] }
 0x433   : > { %v1180_v22 = vpop.eup %1179 }
 0x434   : > { %v703_v23 = vmul.f32 %v1180_v22, %v1174_v12  ;;  %v784_v24 = vpop.permute.xlu2 %783  ;;  %v1182_v25 = vpop.eup %1181  ;;  %v1162_v12 = vld [vmem:[%s1691_s8] ss:$0 sm:$0xff] }
 0x435   : > { %804 = vmatpush.msrb.mxu1 %v784_v24  ;;  %v704_v26 = vmul.f32 %v1182_v25, %v1170_v62  ;;  %v687_v27 = vpop.xlane.xlu1 %686  ;;  %v1164_v22 = vld [vmem:[%s1695_s12] ss:$0 sm:$0xff] }
 0x436   : > { %1077 = vmatmul.msk.f32.vlgmr.msra.gmra.mxu1 %vm554_vm5, %v703_v23  ;;  %1183 = vrcp.f32 %v687_v27 }
 0x43c   : > { %v1184_v28 = vpop.eup %1183 }
 0x43d   : > { %v701_v30 = vmul.f32 %v1184_v28, %v1176_v15  ;;  %v924_v15 = vld [vmem:[%s1694_s11 + $0x10] sm:$0xff] }
 0x43e   : > { %1078 = vmatmul.msk.f32.vlgmr.msrb.gmra.mxu1 %vm554_vm5, %v704_v26  ;;  %951 = vmatpush.msrb.mxu0 %v924_v15 }
 0x440   : > { %952 = vmatpush.msrb.mxu0 %v923_v16 }
 0x442   : > { %953 = vmatpush.msrb.mxu0 %v922_v17 }
 0x44c   : > { %v706_v29 = vpop.permute.xlu1 %705 }
 0x44d   : > { %726 = vmatpush.msrb.mxu2 %v706_v29 }
 0x44e   : > { %1075 = vmatmul.msk.f32.vlgmr.msrb.gmra.mxu2 %vm554_vm5, %v701_v30 }
 0x44f   : > { %849 = vmatpush.msra.mxu2 %v829_v34 }
 0x451   : > { %850 = vmatpush.msra.mxu2 %v828_v35 }
 0x453   : > { %851 = vmatpush.msra.mxu2 %v827_v36 }
 0x455   : > { %852 = vmatpush.msra.mxu2 %v826_v37 }
 0x4a3   : > { %v754_v31 = vpop.f32.mrf.mxu3 }
 0x4a4   : > { %810 = vrot.lane.b32.xlu0 %v754_v31, %s1326_s18  ;;  %s975_s18 = sshll.u32 %s971_s19, 4  ;;  %s976_s18 = int_to_ptr.hbm [resolvable:$true] %s975_s18 }
 0x4b3   : > { %v780_v32 = vpop.f32.mrf.mxu1 }
 0x4b4   : > { %814 = vrot.lane.b32.xlu2 %v780_v32, %s1327_s24  ;;  %s1261_s24 = sshra.s32 %s976_s18, 4  ;;  %s1262_s24 = int_to_ptr.hbm [resolvable:$true] %s1261_s24 }
 0x4b5   : > { %p1268_p9 = scmp.lt.s32.totalorder %s1262_s24, %s1696_s13 }
 0x4bb   : > { %v806_v33 = vpop.f32.mrf.mxu1 }
 0x4bc   : > { %818 = vrot.lane.b32.xlu0 %v806_v33, %s1328_s23  ;;  %s1263_s23 = scalar_lea.hbm %s1262_s24, 8 }
 0x4bd   : > { %p1264_p1 = scmp.ne.s32.totalorder %s1262_s24, %s1263_s23  ;;  %p1269_p10 = scmp.lt.s32.totalorder %s1267_s21, %s1263_s23 }
 0x4bf   : > { %p1265_p4 = pnand %p1264_p1, %p1465_p3  ;;  %p1270_p2 = por %p1269_p10, %p1268_p9 }
 0x4c1   : > { %p1266_p8 = pneg %p1265_p4 }
 0x4c3   : > { %p1271_p11 = pnand %p1270_p2, %p1266_p8 }
 0x4d1   : > { %v728_v39 = vpop.f32.mrf.mxu2 }
 0x50e   : > { %v815_v41 = vpop.permute.xlu2 %814 }
 0x516   : > { %v811_v38 = vpop.permute.xlu0 %810 }
 0x517   : > { %v821_v40 = vsel %vm554_vm5, %v728_v39, %v811_v38 }
 0x518   : > { %v823_v42 = vsel %vm822_vm6, %v821_v40, %v815_v41 }
 0x52e   : > { %v819_v43 = vpop.permute.xlu0 %818 }
 0x52f   : > { %v825_v44 = vsel %vm824_vm7, %v823_v42, %v819_v43 }
 0x530   : > { %1079 = vmatmul.msk.f32.vlgmr.msra.gmra.mxu2 %vm476_vm0, %v825_v44 }
 0x5b3   : > { %v854_v46 = vpop.f32.mrf.mxu2 }
 0x5b4   : > { %v855_v47 = vadd.f32 %v1160_v45, %v854_v46 }
 0x5b6   : > { %v1589_v48 = vadd.f32 %v855_v47, %v1506_v0  ;;  %v892_v0 = vld [vmem:[%s1692_s9 + $0x10] sm:$0xff] }
 0x5b7   : > { %914 = vmatpush.msra.mxu3 %v892_v0 }
 0x5b8   : > { %v860_v49 = vsel %vm476_vm0, %v1589_v48, 0.0 }
 0x5b9   : > { %861 = vadd.xlane.f32.xlu2 %v860_v49  ;;  %915 = vmatpush.msra.mxu3 %v891_v56 }
 0x5bb   : > { %916 = vmatpush.msra.mxu3 %v890_v57 }
 0x62c   : > { %v862_v50 = vpop.xlane.xlu2 %861 }
 0x62d   : > { %v863_v51 = vmul.f32 %v862_v50, %v1510_v8 }
 0x62f   : > { %v864_v52 = vsub.f32 %v1589_v48, %v863_v51 }
 0x631   : > { %v865_v53 = vmul.f32 %v864_v52, %v864_v52 }
 0x633   : > { %v866_v54 = vsel %vm476_vm0, %v865_v53, 0.0 }
 0x634   : > { %867 = vadd.xlane.f32.xlu0 %v866_v54 }
 0x6a7   : > { %v868_v61 = vpop.xlane.xlu0 %867 }
 0x6a8   : > { %v869_v62 = vmul.f32 %v868_v61, %v1510_v8 }
 0x6aa   : > { %v870_v1 = vadd.f32 1e-05, %v869_v62 }
 0x6ac   : > { %1185 = vrsqrt.f32 %v870_v1  ;;  %vm877_vm9 = vweird.f32 %v870_v1 }
 0x6b2   : > { %v1186_v3 = vpop.eup %1185 }
 0x6b3   : > { %v872_v4 = vmul.f32 %v1186_v3, %v870_v1  ;;  %vm878_vm8 = vweird.f32 %v1186_v3 }
 0x6b4   : > { %vm879_vm10 = vmor %vm877_vm9, %vm878_vm8 }
 0x6b5   : > { %v873_v5 = vmul.f32 %v1186_v3, %v872_v4 }
 0x6b7   : > { %v874_v6 = vmul.f32 0.5, %v873_v5 }
 0x6b9   : > { %v875_v7 = vsub.f32 1.5, %v874_v6 }
 0x6bb   : > { %v876_v8 = vmul.f32 %v1186_v3, %v875_v7 }
 0x6bd   : > { %v880_v10 = vsel %vm879_vm10, %v1186_v3, %v876_v8 }
 0x6be   : > { %v881_v11 = vmul.f32 %v880_v10, %v864_v52 }
 0x6c0   : > { %v885_v13 = vmul.f32 %v1161_v9, %v881_v11 }
 0x6c2   : > { %v889_v14 = vadd.f32 %v1162_v12, %v885_v13 }
 0x6c4   : > { %1080 = vmatmul.msk.f32.vlgmr.msra.gmra.mxu3 %vm476_vm0, %v889_v14 }
 0x747   : > { %v918_v19 = vpop.f32.mrf.mxu3 }
 0x748   : > { %v919_v20 = vadd.f32 %v1163_v18, %v918_v19 }
 0x74a   : > { %v921_v21 = vmax.f32 %v919_v20, 0.0 }
 0x74c   : > { %1081 = vmatmul.msk.f32.vlgmr.msrb.gmra.mxu0 %vm934_vm11, %v921_v21 }
 0x7c9   : > { %v955_v23 = vpop.f32.mrf.mxu0 }
 0x7ca   : > { %v956_v24 = vadd.f32 %v1164_v22, %v955_v23 }
 0x7cc   : > { %v958_v25 = vadd.f32 %v956_v24, %v1589_v48 }
 0x7ce   : > { %959 = vst.msk [vmem:[%s472_s30] sm:$0xff] %vm476_vm0, %v958_v25 }
 0x7cf   : > { %1274 = shalt.err (!%p1271_p11)
}
 0x7d0   : > { %1092 = dma.vmem_to_hbm [thread:$0]  (%p1465_p3), %s974_s16, 128, %s976_s18, %s961_s29  }
 0x7d1 PF: > { %s1718_s17 = sld [smem:[#allocation11_spill]]  ;;  %p1720_p12 = scmp.ge.s32.totalorder %s1317_s28, 2 }
 0x7d3   : > { %p1103_p13 = pnand %p1720_p12, %p1434_p6 }
 0x7d5   : > { %p1104_p0 = pneg %p1103_p13 }
 0x7d7   : > { %s987_s27 = sand.u32 1, %s1718_s17  }
 0x7d8   : > { %s988_s19 = scalar_lea.sflag [#allocation4], %s987_s27 }
 0x7d9   : > { %1300 = dma.done.wait (%p1104_p0), %s988_s19, 128  }
 0x7da   : > { %1302 = vsyncadd (%p1104_p0), %s988_s19, 4294967168  ;;  %s1721_s28 = sld [smem:[#allocation14_spill]]  ;;  %s1724_s25 = smov %s1309_s26 }
 0x7db   : > { %s1722_s30 = sld [smem:[#allocation12_spill]] }
 0x7dc   : > { %s1723_s27 = sld [smem:[#allocation15_spill]] }
 0x7e0   : > { %p27_p5 = scmp.ge.s32.totalorder %s1721_s28, 4  }
 0x7e1   : > { %s1725_s26 = smov %s1722_s30 }
 0x7e2   :  { %29 = sbr.rel (!%p27_p5) target bundleno = 8 (0x8), region = 121 }
 0x7e7   :  { %994 = vsyncpa [#allocation3], 1 }
 0x7e8   :  { %996 = vsyncpa [#allocation3 + $0x1], 1 }
 0x7e9   :  { %997 = vsyncpa [#allocation6], 1 }
 0x7ea   :  { %998 = vsyncpa [#allocation4], 1 }
 0x7eb   :  { %1000 = vsyncpa [#allocation4 + $0x1], 1 }

</bundles_post_ra>
